<compile_context>
chip_gen: v7x
topology: tpu7x:2x2x1
jax: 0.10.0
libtpu: 0.0.40
codegen_flags: <defaults>
</compile_context>

<pallas_src>
import functools

import jax
import jax.numpy as jnp
from jax.experimental import pallas as pl
from jax.experimental.pallas import tpu as pltpu

IN_FEATURES = 300
OUT_FEATURES = 4
DEFAULT_BLOCK_B = 2048  # batch tile; multiple of 8, v7x-VMEM safe


def _linear_kernel(x_ref, w_ref, b_ref, o_ref):
    # x_ref: (TB, 300), w_ref: (300, 4), b_ref: (1, 4), o_ref: (TB, 4)
    acc = jnp.dot(x_ref[...], w_ref[...], preferred_element_type=jnp.float32)
    o_ref[...] = (acc + b_ref[...]).astype(o_ref.dtype)


def _round_up(x, m):
    return ((x + m - 1) // m) * m


@functools.partial(jax.jit, static_argnames=("block_b",))
def logistic_regression_forward(x, weight, bias, *, block_b=DEFAULT_BLOCK_B):
    """x: (B, 300) f32, weight: (4, 300) f32, bias: (4,) f32 -> (B, 4) f32."""
    B = x.shape[0]
    w_t = weight.T                       # (300, 4) — glue, plain JAX
    b2d = bias.reshape(1, OUT_FEATURES)  # (1, 4)   — 2-D for TPU layout

    # Batch tile: multiple of 8 sublanes, never larger than needed for small B.
    tb = min(block_b, _round_up(B, 8))
    grid = (pl.cdiv(B, tb),)

    cost = pl.CostEstimate(
        flops=2 * B * IN_FEATURES * OUT_FEATURES,
        transcendentals=0,
        bytes_accessed=4 * (B * IN_FEATURES          # read X
                            + IN_FEATURES * OUT_FEATURES  # read W
                            + OUT_FEATURES                # read b
                            + B * OUT_FEATURES),          # write out
    )

    return pl.pallas_call(
        _linear_kernel,
        out_shape=jax.ShapeDtypeStruct((B, OUT_FEATURES), jnp.float32),
        grid=grid,
        in_specs=[
            # X streams through VMEM, tiled along batch (double-buffered).
            pl.BlockSpec((tb, IN_FEATURES), lambda i: (i, 0)),
            # Weight and bias stay resident (same block every grid step).
            pl.BlockSpec((IN_FEATURES, OUT_FEATURES), lambda i: (0, 0)),
            pl.BlockSpec((1, OUT_FEATURES), lambda i: (0, 0)),
        ],
        out_specs=pl.BlockSpec((tb, OUT_FEATURES), lambda i: (i, 0)),
        compiler_params=pltpu.CompilerParams(
            dimension_semantics=("parallel",)),  # 2-TC sharding on v7x
        cost_estimate=cost,
    )(x, w_t, b2d)


if __name__ == "__main__":
    key = jax.random.PRNGKey(0)
    kx, kw, kb, kx2 = jax.random.split(key, 4)

    # Deterministic synthetic parameters (shapes from torch.nn.Linear(300, 4)).
    bound = 1.0 / jnp.sqrt(jnp.float32(IN_FEATURES))
    weight = jax.random.uniform(kw, (OUT_FEATURES, IN_FEATURES),
                                minval=-bound, maxval=bound, dtype=jnp.float32)
    bias = jax.random.uniform(kb, (OUT_FEATURES,),
                              minval=-bound, maxval=bound, dtype=jnp.float32)

    # Small batch (single grid step).
    B = 8
    x = jax.random.normal(kx, (B, IN_FEATURES), dtype=jnp.float32)
    out = jax.block_until_ready(logistic_regression_forward(x, weight, bias))
    ref = x @ weight.T + bias
    assert out.shape == (B, OUT_FEATURES)
    assert jnp.allclose(out, ref, atol=1e-5, rtol=1e-5)

    # Multi-step grid with a partial last tile (exercises the batch tiling).
    B2 = 200
    x2 = jax.random.normal(kx2, (B2, IN_FEATURES), dtype=jnp.float32)
    out2 = jax.block_until_ready(
        logistic_regression_forward(x2, weight, bias, block_b=64))
    ref2 = x2 @ weight.T + bias
    assert out2.shape == (B2, OUT_FEATURES)
    assert jnp.allclose(out2, ref2, atol=1e-5, rtol=1e-5)

    print("KERNEL_OK")
</pallas_src>

<mosaic_0001>
module attributes {stable_mosaic.version = 11 : i64} {
  func.func @_linear_kernel(%arg0: i32, %arg1: memref<8x300xf32, #tpu.memory_space<vmem>>, %arg2: memref<300x4xf32, #tpu.memory_space<vmem>>, %arg3: memref<1x4xf32, #tpu.memory_space<vmem>>, %arg4: memref<8x4xf32, #tpu.memory_space<vmem>>) attributes {dimension_semantics = [#tpu.dimension_semantics<parallel>], iteration_bounds = array<i64: 1>, scalar_prefetch = 0 : i64, scratch_operands = 0 : i64, tpu.core_type = #tpu.core_type<tc>, window_params = [{transform_indices = @transform_0, window_bounds = array<i64: 8, 300>}, {pipeline_mode = #tpu.pipeline_mode<synchronous>, transform_indices = @transform_1, window_bounds = array<i64: 300, 4>}, {pipeline_mode = #tpu.pipeline_mode<synchronous>, transform_indices = @transform_2, window_bounds = array<i64: 1, 4>}, {transform_indices = @transform_3, window_bounds = array<i64: 8, 4>}]} {
    %c0 = arith.constant 0 : index
    %c0_0 = arith.constant 0 : index
    %0 = vector.load %arg1[%c0, %c0_0] : memref<8x300xf32, #tpu.memory_space<vmem>>, vector<8x300xf32>
    %c0_1 = arith.constant 0 : index
    %c0_2 = arith.constant 0 : index
    %1 = vector.load %arg2[%c0_1, %c0_2] : memref<300x4xf32, #tpu.memory_space<vmem>>, vector<300x4xf32>
    %cst = arith.constant dense<0.000000e+00> : vector<8x4xf32>
    %2 = tpu.matmul %0, %1, %cst {dimension_numbers = #tpu.dot_dimension_numbers<[1], [0], [0], [1], [0, 0, 1, 1], [], []>} : vector<8x300xf32>, vector<300x4xf32>, vector<8x4xf32> -> vector<8x4xf32>
    %c0_3 = arith.constant 0 : index
    %c0_4 = arith.constant 0 : index
    %3 = vector.load %arg3[%c0_3, %c0_4] : memref<1x4xf32, #tpu.memory_space<vmem>>, vector<1x4xf32>
    %4 = vector.broadcast %3 : vector<1x4xf32> to vector<8x4xf32>
    %5 = arith.addf %2, %4 : vector<8x4xf32>
    %c0_5 = arith.constant 0 : index
    %c0_6 = arith.constant 0 : index
    %6 = vector.load %arg4[%c0_5, %c0_6] : memref<8x4xf32, #tpu.memory_space<vmem>>, vector<8x4xf32>
    tpu.vector_store %arg4[%c0_5, %c0_6], %5 {strides = array<i32>} : memref<8x4xf32, #tpu.memory_space<vmem>>, vector<8x4xf32>,
    return
  }
  func.func @transform_0(%arg0: i32) -> (i32, i32) {
    %c0_i32 = arith.constant 0 : i32
    %c0_i32_0 = arith.constant 0 : i32
    return %arg0, %c0_i32 : i32, i32
  }
  func.func @transform_1(%arg0: i32) -> (i32, i32) {
    %c0_i32 = arith.constant 0 : i32
    %c0_i32_0 = arith.constant 0 : i32
    %c0_i32_1 = arith.constant 0 : i32
    return %c0_i32, %c0_i32_0 : i32, i32
  }
  func.func @transform_2(%arg0: i32) -> (i32, i32) {
    %c0_i32 = arith.constant 0 : i32
    %c0_i32_0 = arith.constant 0 : i32
    %c0_i32_1 = arith.constant 0 : i32
    return %c0_i32, %c0_i32_0 : i32, i32
  }
  func.func @transform_3(%arg0: i32) -> (i32, i32) {
    %c0_i32 = arith.constant 0 : i32
    %c0_i32_0 = arith.constant 0 : i32
    return %arg0, %c0_i32 : i32, i32
  }
}

</mosaic_0001>

<bundles_post_ra>
// kernel: logistic_regression_forward.1
= control target key start
LH: loop header
LB: loop body
LE: loop exit
PB: predicated region body
PF: predicated region fallthrough
CT: control target
= control target key end

     0   :  { %v322_v3 = vmov 0.0|0.0   ;;  %vm323_vm0 = vmmov 0   ;;  %v324_v8 = vmov 0.0   ;;  %vm66_vm1 = vcmask 1043456   ;;  %s475_s1 = inlined_call_operand.vmem [shape: f32[300,4], index: 1, kind: input, shape index: {}]   ;;  %s476_s0 = inlined_call_operand.vmem [shape: f32[8,300], index: 0, kind: input, shape index: {}]   ;;  %s477_s2 = inlined_call_operand.vmem [shape: f32[1,4], index: 2, kind: input, shape index: {}]   ;;  %s478_s3 = inlined_call_operand.vmem [shape: f32[8,4], index: 3, kind: output, shape index: {}]  }
   0x1   :  { %v33_v0 = vld [vmem:[%s475_s1 + $0x80] sm:$0xff]  ;;  %v34_v1 = vld [vmem:[%s475_s1 + $0x88] sm:$0xff]  ;;  %308 = vmatprep.subr.bf16.mxu1 %v322_v3  ;;  %v35_v6 = vld [vmem:[%s475_s1 + $0x90] sm:$0xff]  ;;  %273 = vmatprep.mubr.msk.f32.mxu1 %vm323_vm0, %v324_v8  ;;  %vm325_vm2 = vmmov 1   ;;  %vm62_vm4 = vcmask 359424   ;;  %vm210_vm5 = vcmask 31744  }
   0x2   :  { %v17_v2 = vld [vmem:[%s475_s1] sm:$0xff]  ;;  %v276_v4 = vpack.c.bf16 %v34_v1, %v33_v0  ;;  %v18_v5 = vld [vmem:[%s475_s1 + $0x8] sm:$0xff]  ;;  %v36_v7 = vld [vmem:[%s475_s1 + $0x98] sm:$0xff] }
   0x3   :  { %v278_v9 = vpack.c.bf16 %v18_v5, %v17_v2  ;;  %v280_v10 = vpack.c.bf16 %v36_v7, %v35_v6  ;;  %v19_v11 = vld [vmem:[%s475_s1 + $0x10] sm:$0xff]  ;;  %v20_v12 = vld [vmem:[%s475_s1 + $0x18] sm:$0xff]  ;;  %v37_v13 = vld [vmem:[%s475_s1 + $0xa0] sm:$0xff] }
   0x4   :  { %277 = vmatprep.subr.bf16.mxu0 %v276_v4  ;;  %v38_v14 = vld [vmem:[%s475_s1 + $0xa8] sm:$0xff]  ;;  %v282_v15 = vpack.c.bf16 %v20_v12, %v19_v11  ;;  %v21_v17 = vld [vmem:[%s475_s1 + $0x20] sm:$0xff]  ;;  %v39_v19 = vld [vmem:[%s475_s1 + $0xb0] sm:$0xff] }
   0x5   :  { %279 = vmatpush3.bf16.msra.mxu0 %v278_v9  ;;  %v284_v16 = vpack.c.bf16 %v38_v14, %v37_v13  ;;  %v22_v18 = vld [vmem:[%s475_s1 + $0x28] sm:$0xff]  ;;  %v40_v20 = vld [vmem:[%s475_s1 + $0xb8] sm:$0xff]  ;;  %v23_v22 = vld [vmem:[%s475_s1 + $0x30] sm:$0xff] }
   0x6   :  { %281 = vmatprep.subr.bf16.mxu0 %v280_v10  ;;  %v286_v21 = vpack.c.bf16 %v22_v18, %v21_v17  ;;  %v288_v23 = vpack.c.bf16 %v40_v20, %v39_v19  ;;  %v24_v24 = vld [vmem:[%s475_s1 + $0x38] sm:$0xff]  ;;  %v49_v25 = vld [vmem:[%s475_s1 + $0x100] sm:$0xff]  ;;  %v50_v26 = vld [vmem:[%s475_s1 + $0x108] sm:$0xff] }
   0x7   :  { %v41_v27 = vld [vmem:[%s475_s1 + $0xc0] sm:$0xff]  ;;  %v42_v28 = vld [vmem:[%s475_s1 + $0xc8] sm:$0xff]  ;;  %v309_v29 = vpack.c.bf16 %v50_v26, %v49_v25  ;;  %v51_v30 = vld [vmem:[%s475_s1 + $0x110] sm:$0xff]  ;;  %v290_v32 = vpack.c.bf16 %v24_v24, %v23_v22 }
   0x8   :  { %v52_v31 = vld [vmem:[%s475_s1 + $0x118] sm:$0xff]  ;;  %v25_v33 = vld [vmem:[%s475_s1 + $0x40] sm:$0xff]  ;;  %v15_v35 = vld [vmem:[%s476_s0 + $0x8] sm:$0xff]  ;;  %v292_v36 = vpack.c.bf16 %v42_v28, %v41_v27 }
   0x9   :  { %283 = vmatpush3.bf16.msra.mxu0 %v282_v15  ;;  %310 = vmatpush3.bf16.msra.mxu1 %v309_v29  ;;  %v312_v34 = vpack.c.bf16 %v52_v31, %v51_v30  ;;  %v26_v37 = vld [vmem:[%s475_s1 + $0x48] sm:$0xff]  ;;  %v53_v38 = vld [vmem:[%s475_s1 + $0x120] sm:$0xff]  ;;  %v43_v40 = vld [vmem:[%s475_s1 + $0xd0] sm:$0xff] }
   0xa   :  { %285 = vmatprep.subr.bf16.mxu0 %v284_v16  ;;  %311 = vmatprep.subr.bf16.mxu1 %v322_v3  ;;  %v54_v39 = vld [vmem:[%s475_s1 + $0x128] sm:$0xf]  ;;  %v44_v41 = vld [vmem:[%s475_s1 + $0xd8] sm:$0xff]  ;;  %v294_v42 = vpack.c.bf16 %v26_v37, %v25_v33  ;;  %v27_v45 = vld [vmem:[%s475_s1 + $0x50] sm:$0xff] }
   0xb   :  { %134 = vmatprep.mubr.f32.mxu0 %v15_v35  ;;  %v315_v43 = vpack.c.bf16 %v54_v39, %v53_v38  ;;  %v296_v44 = vpack.c.bf16 %v44_v41, %v43_v40  ;;  %v28_v46 = vld [vmem:[%s475_s1 + $0x58] sm:$0xff]  ;;  %vm316_vm3 = vmpackc.low %vm66_vm1, %vm325_vm2  ;;  %v45_v47 = vld [vmem:[%s475_s1 + $0xe0] sm:$0xff] }
   0xc   :  { %v46_v48 = vld [vmem:[%s475_s1 + $0xe8] sm:$0xff]  ;;  %v298_v49 = vpack.c.bf16 %v28_v46, %v27_v45  ;;  %v16_v50 = vld [vmem:[%s476_s0 + $0x10] sm:$0xff]  ;;  %v29_v52 = vld [vmem:[%s475_s1 + $0x60] sm:$0xff] }
   0xd   :  { %287 = vmatpush3.bf16.msra.mxu0 %v286_v21  ;;  %313 = vmatpush3.bf16.msra.mxu1 %v312_v34  ;;  %v300_v51 = vpack.c.bf16 %v46_v48, %v45_v47  ;;  %v30_v53 = vld [vmem:[%s475_s1 + $0x68] sm:$0xff]  ;;  %v47_v54 = vld [vmem:[%s475_s1 + $0xf0] sm:$0xff]  ;;  %v48_v55 = vld [vmem:[%s475_s1 + $0xf8] sm:$0xff] }
   0xe   :  { %289 = vmatprep.subr.bf16.mxu0 %v288_v23  ;;  %314 = vmatprep.subr.bf16.mxu1 %v322_v3  ;;  %v302_v56 = vpack.c.bf16 %v30_v53, %v29_v52  ;;  %v304_v57 = vpack.c.bf16 %v48_v55, %v47_v54  ;;  %v31_v58 = vld [vmem:[%s475_s1 + $0x70] sm:$0xff]  ;;  %v32_v59 = vld [vmem:[%s475_s1 + $0x78] sm:$0xff]  ;;  %v14_v61 = vld [vmem:[%s476_s0] sm:$0xff] }
   0xf   :  { %v306_v60 = vpack.c.bf16 %v32_v59, %v31_v58  ;;  %v216_v2 = vld [vmem:[%s477_s2] ss:$0 sm:$0xff] }
  0x11   :  { %291 = vmatpush3.bf16.msra.mxu0 %v290_v32  ;;  %317 = vmatpush3.bf16.msk.msra.mxu1 %vm316_vm3, %v315_v43 }
  0x12   :  { %293 = vmatprep.subr.bf16.mxu0 %v292_v36 }
  0x14   :  { %274 = vmatmul.mubr.msk.f32.vlgmr.msra.gmra.mrb[0].mxu1 %vm62_vm4, %v16_v50 }
  0x15   :  { %295 = vmatpush3.bf16.msra.mxu0 %v294_v42 }
  0x16   :  { %297 = vmatprep.subr.bf16.mxu0 %v296_v44 }
  0x19   :  { %299 = vmatpush3.bf16.msra.mxu0 %v298_v49 }
  0x1a   :  { %301 = vmatprep.subr.bf16.mxu0 %v300_v51 }
  0x1d   :  { %303 = vmatpush3.bf16.msra.mxu0 %v302_v56 }
  0x1e   :  { %305 = vmatprep.subr.bf16.mxu0 %v304_v57 }
  0x21   :  { %307 = vmatpush3.bf16.msra.mxu0 %v306_v60 }
  0x24   :  { %135 = vmatmul.mubr.f32.vlgmr.msra.gmra.mrb[0].mxu0 %v14_v61 }
  0xe7   :  { %v206_v62 = vpop.f32.mrb[0].mxu1 }
  0xe8   :  { %v275_v63 = vpop.f32.mrb[1].mxu1 }
  0xf7   :  { %v251_v0 = vpop.f32.mrb[0].mxu0 }
  0xf8   :  { %v252_v1 = vpop.f32.mrb[1].mxu0 }
  0xf9   :  { %v253_v3 = vadd.f32 %v252_v1, %v251_v0 }
  0xfb   :  { %v137_v4 = vadd.f32 %v253_v3, %v216_v2 }
  0xfd   :  { %v207_v5 = vadd.f32 %v206_v62, %v137_v4 }
  0xff   :  { %211 = vst.msk [vmem:[%s478_s3] sm:$0xff] %vm210_vm5, %v207_v5 }

</bundles_post_ra>
